<compile_context>
chip_gen: v7x
topology: tpu7x:2x2x1
jax: 0.10.0
libtpu: 0.0.40
codegen_flags: <defaults>
</compile_context>

<pallas_src>
import jax
import jax.numpy as jnp
from jax.experimental import pallas as pl
from jax.experimental.pallas import tpu as pltpu


def _chomp_copy_kernel(x_ref, o_ref):
    # Aligned path: the BlockSpec already fetched only the kept region.
    o_ref[...] = x_ref[...]


def _chomp_slice_kernel(x_ref, o_ref):
    # Fallback path: full rows fetched; keep the leading H_out*W lanes.
    keep = o_ref.shape[-1]
    o_ref[...] = x_ref[:, :keep]


def chomp2d(x: jax.Array, chomp_size: int) -> jax.Array:
    """Pallas implementation of Chomp2d.forward for NCHW input."""
    n, c, h, w = x.shape
    h_out = h - chomp_size
    assert 0 < h_out <= h, "chomp_size must be in [0, H)"

    planes = n * c
    row_in = h * w          # flattened plane length (input)
    row_out = h_out * w     # flattened plane length (output / kept prefix)
    itemsize = jnp.dtype(x.dtype).itemsize

    # ---- pick how many planes per grid step (TB) -------------------------
    # Target ~2 MiB input tiles; TB must be a multiple of 8 (sublane rule)
    # unless it equals the full leading dim.
    plane_bytes = row_in * itemsize
    target_tile_bytes = 2 * 1024 * 1024
    tb = target_tile_bytes // max(plane_bytes, 1)
    tb = max(8, (tb // 8) * 8)
    if tb >= planes:
        tb = planes  # one block covers everything (equal-to-full-dim is valid)
    # Prefer a grid of length >= 2 when there is enough work, so v7x's two
    # TensorCores can both contribute (no-op on v5e/v6e).
    if tb == planes and planes >= 16:
        half = max(8, ((planes + 1) // 2 // 8) * 8)
        if half < planes:
            tb = half

    grid = (pl.cdiv(planes, tb),)

    # ---- express the chomp in the BlockSpec when lane-aligned ------------
    x_flat = x.reshape(planes, row_in)

    if row_out == row_in or row_out % 128 == 0:
        # Fetch only the kept prefix of each plane: saves chomp_size/H of the
        # input HBM traffic.  Block index 0 along the lane axis selects
        # elements [0, row_out).
        in_spec = pl.BlockSpec((tb, row_out), lambda i: (i, 0))
        kernel = _chomp_copy_kernel
        read_bytes = planes * row_out * itemsize
    else:
        # Unaligned kept width: read full rows, slice lanes in-kernel.
        in_spec = pl.BlockSpec((tb, row_in), lambda i: (i, 0))
        kernel = _chomp_slice_kernel
        read_bytes = planes * row_in * itemsize

    write_bytes = planes * row_out * itemsize

    out_flat = pl.pallas_call(
        kernel,
        out_shape=jax.ShapeDtypeStruct((planes, row_out), x.dtype),
        grid_spec=pltpu.PrefetchScalarGridSpec(
            num_scalar_prefetch=0,
            grid=grid,
            in_specs=[in_spec],
            out_specs=pl.BlockSpec((tb, row_out), lambda i: (i, 0)),
        ),
        compiler_params=pltpu.CompilerParams(
            dimension_semantics=("parallel",),
        ),
        cost_estimate=pl.CostEstimate(
            flops=0,
            transcendentals=0,
            bytes_accessed=read_bytes + write_bytes,
        ),
    )(x_flat)

    return out_flat.reshape(n, c, h_out, w)


if __name__ == "__main__":
    # Chomp2d has no learnable parameters; only a chomp_size hyperparameter.
    chomp_size = 3

    key = jax.random.PRNGKey(0)
    n, c, h, w = 2, 4, 16, 16
    x = jax.random.normal(key, (n, c, h, w), dtype=jnp.float32)

    y = chomp2d(x, chomp_size)
    y = jax.block_until_ready(y)

    # Reference check against plain-JAX slice (same semantics as PyTorch).
    y_ref = x[:, :, : h - chomp_size, :]
    assert y.shape == (n, c, h - chomp_size, w), y.shape
    assert jnp.array_equal(y, y_ref), "mismatch vs reference slice"

    print("KERNEL_OK")
</pallas_src>

<mosaic_0001>
module attributes {stable_mosaic.version = 11 : i64} {
  func.func @_chomp_slice_kernel(%arg0: i32, %arg1: memref<8x256xf32, #tpu.memory_space<vmem>>, %arg2: memref<8x208xf32, #tpu.memory_space<vmem>>) attributes {dimension_semantics = [#tpu.dimension_semantics<parallel>], iteration_bounds = array<i64: 1>, scalar_prefetch = 0 : i64, scratch_operands = 0 : i64, tpu.core_type = #tpu.core_type<tc>, window_params = [{transform_indices = @transform_0, window_bounds = array<i64: 8, 256>}, {transform_indices = @transform_1, window_bounds = array<i64: 8, 208>}]} {
    %c0 = arith.constant 0 : index
    %c0_0 = arith.constant 0 : index
    %0 = vector.load %arg1[%c0, %c0_0] : memref<8x256xf32, #tpu.memory_space<vmem>>, vector<8x208xf32>
    %c0_1 = arith.constant 0 : index
    %c0_2 = arith.constant 0 : index
    %1 = vector.load %arg2[%c0_1, %c0_2] : memref<8x208xf32, #tpu.memory_space<vmem>>, vector<8x208xf32>
    tpu.vector_store %arg2[%c0_1, %c0_2], %0 {strides = array<i32>} : memref<8x208xf32, #tpu.memory_space<vmem>>, vector<8x208xf32>,
    return
  }
  func.func @transform_0(%arg0: i32) -> (i32, i32) {
    %c0_i32 = arith.constant 0 : i32
    %c0_i32_0 = arith.constant 0 : i32
    return %arg0, %c0_i32 : i32, i32
  }
  func.func @transform_1(%arg0: i32) -> (i32, i32) {
    %c0_i32 = arith.constant 0 : i32
    %c0_i32_0 = arith.constant 0 : i32
    return %arg0, %c0_i32 : i32, i32
  }
}

</mosaic_0001>

<bundles_post_ra>
// kernel: tpu_custom_call.1
= control target key start
LH: loop header
LB: loop body
LE: loop exit
PB: predicated region body
PF: predicated region fallthrough
CT: control target
= control target key end

     0   :  { %6 = vsyncpa [#allocation3], 0  ;;  %s127_s0 = inlined_call_operand.hbm [shape: f32[8,256], index: 0, kind: input, shape index: {}]   ;;  %s128_s1 = inlined_call_operand.hbm [shape: f32[8,208], index: 1, kind: output, shape index: {}]  }
   0x1   :  { %7 = vsyncpa [#allocation4], 0  ;;  %s91_s6 = smov [#allocation2]   ;;  %s43_s10 = scalar_lea.hbm %s127_s0, 256 }
   0x2   :  { %s14_s7 = sshll.u32 %s91_s6, 4  ;;  %p44_p0 = scmp.ne.s32.totalorder %s127_s0, %s43_s10  ;;  %s15_s7 = int_to_ptr.vmem [resolvable:$true] %s14_s7 }
   0x3   :  { %p47_p1 = scmp.lt.u32.totalorder %s43_s10, %s127_s0 }
   0x5   :  { %p49_p2 = pnand %p47_p1, %p44_p0 }
   0x7   :  { %52 = shalt.err (!%p49_p2)
}
   0x8   :  { %s53_s15 = scalar_lea.vmem %s15_s7, 256  ;;  %p58_p4 = scmp.lt.s32.totalorder %s15_s7, %s15_s7 }
   0x9   :  { %p54_p3 = scmp.ne.s32.totalorder %s15_s7, %s53_s15  ;;  %p59_p5 = scmp.lt.s32.totalorder %s53_s15, %s53_s15 }
   0xb   :  { %p60_p6 = por %p59_p5, %p58_p4 }
   0xd   :  { %p61_p7 = pnand %p60_p6, %p54_p3 }
   0xf   :  { %64 = shalt.err (!%p61_p7)
}
  0x10   :  { %17 = dma.hbm_to_vmem [thread:$0]  %s127_s0, 256, %s15_s7, [#allocation3]  }
  0x11   :  { %87 = dma.done.wait [#allocation3], 256  }
  0x12   :  { %88 = vsyncadd [#allocation3], 4294967040  ;;  %s92_s18 = smov [#allocation5]   ;;  %vm24_vm0 = vcmask 654336   ;;  %v21_v0 = vld [vmem:[#allocation2] sm:$0xff]  ;;  %v22_v1 = vld [vmem:[#allocation2 + $0x8] sm:$0xff] }
  0x13   :  { %s32_s19 = sshll.u32 %s92_s18, 4  ;;  %23 = vst [vmem:[#allocation5] sm:$0xff] %v21_v0  ;;  %25 = vst.msk [vmem:[#allocation5 + $0x8] sm:$0xff] %vm24_vm0, %v22_v1  ;;  %s33_s19 = int_to_ptr.vmem [resolvable:$true] %s32_s19 }
  0x14   :  { %s65_s20 = scalar_lea.vmem %s33_s19, 256  ;;  %p70_p9 = scmp.lt.s32.totalorder %s33_s19, %s33_s19 }
  0x15   :  { %p66_p8 = scmp.ne.s32.totalorder %s33_s19, %s65_s20  ;;  %p71_p10 = scmp.lt.s32.totalorder %s65_s20, %s65_s20 }
  0x17   :  { %p72_p11 = por %p71_p10, %p70_p9 }
  0x19   :  { %p73_p12 = pnand %p72_p11, %p66_p8 }
  0x1b   :  { %76 = shalt.err (!%p73_p12)
}
  0x1c   :  { %s77_s0 = scalar_lea.hbm %s128_s1, 256 }
  0x1d   :  { %p78_p13 = scmp.ne.s32.totalorder %s128_s1, %s77_s0  ;;  %p81_p0 = scmp.lt.u32.totalorder %s77_s0, %s128_s1 }
  0x1f   :  { %p83_p1 = pnand %p81_p0, %p78_p13 }
  0x21   :  { %86 = shalt.err (!%p83_p1)
}
  0x22   :  { %35 = dma.vmem_to_hbm [thread:$0]  %s33_s19, 256, %s128_s1, [#allocation4]  }
  0x23   :  { %89 = dma.done.wait [#allocation4], 256  }
  0x24   :  { %90 = vsyncadd [#allocation4], 4294967040 }
  0x25   :  { %39 = vsyncpa [#allocation3], 1 }
  0x26   :  { %40 = vsyncpa [#allocation4], 1 }

</bundles_post_ra>
